<compile_context>
chip_gen: v5e
topology: v5e:2x2
jax: 0.10.0
libtpu: 0.0.40
codegen_flags: <defaults>
</compile_context>

<pallas_src>
import functools

import jax
import jax.numpy as jnp
from jax import lax
from jax.experimental import pallas as pl
from jax.experimental.pallas import tpu as pltpu

_MIB = 1 << 20


def _round_up(x: int, m: int) -> int:
    return (x + m - 1) // m * m


def _sublane(dtype) -> int:
    return max(8, 32 // jnp.dtype(dtype).itemsize)


def _tile_rows(budget_bytes: int, row_bytes: int, sub: int, total_rows: int):
    tr = int(budget_bytes) // int(row_bytes)
    tr = (tr // sub) * sub
    tr = max(tr, sub)
    if tr >= total_rows:
        return int(total_rows), 1
    return int(tr), int(-(-total_rows // tr))


# --------------------------------------------------------------------------
# In-kernel approximate N(0,1) noise: counter-based uint32 hash, sum of 4
# uniforms.  Pure jnp integer/float ops -> lowers on Mosaic and interpret.
# --------------------------------------------------------------------------
def _u32_mix(x):
    x = x ^ (x >> jnp.uint32(16))
    x = x * jnp.uint32(0x7FEB352D)
    x = x ^ (x >> jnp.uint32(15))
    x = x * jnp.uint32(0x846CA68B)
    x = x ^ (x >> jnp.uint32(16))
    return x


def _tile_normal(shape, seed, i, h):
    rows, cols = shape
    base = _u32_mix((seed & jnp.int32(0x7FFFFFFF)).astype(jnp.uint32)
                    + i.astype(jnp.uint32) * jnp.uint32(0x9E3779B9)
                    + h.astype(jnp.uint32) * jnp.uint32(0x85EBCA77))
    r = lax.broadcasted_iota(jnp.int32, shape, 0)
    c = lax.broadcasted_iota(jnp.int32, shape, 1)
    ctr = (r * cols + c).astype(jnp.uint32)
    r1 = _u32_mix(ctr ^ base)
    r2 = _u32_mix(r1 + jnp.uint32(0x9E3779B9))
    lo = jnp.uint32(0xFFFF)

    def _u(v):  # values < 2**16: go through int32 for a safe int->float cast
        return v.astype(jnp.int32).astype(jnp.float32)

    s = (_u(r1 & lo) + _u(r1 >> jnp.uint32(16))
         + _u(r2 & lo) + _u(r2 >> jnp.uint32(16))) * jnp.float32(1.0 / 65536.0)
    # Sum of 4 U(0,1): mean 2, variance 1/3 -> standardize.
    return (s - jnp.float32(2.0)) * jnp.float32(1.7320508)


# --------------------------------------------------------------------------
# Pass 1: per-sample, PER-LANE min / max / sum of the channel-summed image.
# Accumulator block (8, Lpad): row0=min, row1=max, row2=sum (per lane).
# Optionally also writes the channel-summed image g (f32, lane dense).
# --------------------------------------------------------------------------
def _stats_kernel(x_ref, s_ref, *g_ref, has_channels, write_g,
                  mask_mode, limit, tile_rows, lanes):
    h = pl.program_id(1)

    @pl.when(h == 0)
    def _init():
        lpad = s_ref.shape[1]
        s_ref[...] = jnp.zeros(s_ref.shape, jnp.float32)
        s_ref[0:1, :] = jnp.full((1, lpad), jnp.inf, jnp.float32)
        s_ref[1:2, :] = jnp.full((1, lpad), -jnp.inf, jnp.float32)

    x = x_ref[...].astype(jnp.float32)
    g = jnp.sum(x, axis=0) if has_channels else x            # (TR, L)

    if write_g:
        g_ref[0][...] = g

    if mask_mode == "rows":      # ragged last row-tile
        row = h * tile_rows + lax.broadcasted_iota(jnp.int32, (tile_rows, 1), 0)
        valid = row < limit
    elif mask_mode == "flat":    # padded flattened image (and any ragged rows)
        row = lax.broadcasted_iota(jnp.int32, (tile_rows, lanes), 0)
        col = lax.broadcasted_iota(jnp.int32, (tile_rows, lanes), 1)
        valid = (h * tile_rows + row) * lanes + col < limit
    else:
        valid = None

    if valid is None:
        g_min = g_max = g_sum = g
    else:
        g_min = jnp.where(valid, g, jnp.inf)
        g_max = jnp.where(valid, g, -jnp.inf)
        g_sum = jnp.where(valid, g, 0.0)

    # Sublane reduction only; the cross-lane reduction happens in the XLA glue.
    pmin = jnp.min(g_min, axis=0, keepdims=True)             # (1, L)
    pmax = jnp.max(g_max, axis=0, keepdims=True)
    psum = jnp.sum(g_sum, axis=0, keepdims=True)

    L = lanes
    s_ref[0:1, 0:L] = jnp.minimum(s_ref[0:1, 0:L], pmin)
    s_ref[1:2, 0:L] = jnp.maximum(s_ref[1:2, 0:L], pmax)
    s_ref[2:3, 0:L] = s_ref[2:3, 0:L] + psum


# --------------------------------------------------------------------------
# Pass 2: fused affine + optional Gaussian-ish noise + clip (single sweep).
# --------------------------------------------------------------------------
def _apply_kernel(a_ref, b_ref, seed_ref, x_ref, o_ref, *, has_channels, noise):
    i = pl.program_id(0)
    h = pl.program_id(1)

    x = x_ref[...].astype(jnp.float32)
    g = jnp.sum(x, axis=0) if has_channels else x            # (TR, L)
    g = g * a_ref[i] + b_ref[i]                              # all scales folded

    if noise > 0.0:
        g = g + jnp.float32(noise) * _tile_normal(g.shape, seed_ref[0], i, h)

    o_ref[...] = jnp.clip(g, 0.0, 1.0).astype(o_ref.dtype)


# --------------------------------------------------------------------------
# Wrapper
# --------------------------------------------------------------------------
def gray_document(a, noise: float = 0.0, autoinvert: bool = True, seed=0, *,
                  max_block_bytes=None, out_dtype=jnp.float32):
    """Pallas implementation of GrayDocument.forward.  Returns (N, 1, H, W).

    out_dtype=jnp.bfloat16 halves the output HBM stream if the consumer allows.
    max_block_bytes overrides the auto tile budgets (mainly for testing)."""
    a = jnp.asarray(a)
    assert a.ndim in (3, 4)
    if a.ndim == 3:
        a = a[:, None, :, :]

    if a.dtype == jnp.uint8:
        in_scale = 1.0 / 255.0                    # /255 folded into the affine
    else:
        if a.dtype not in (jnp.float32, jnp.bfloat16):
            a = a.astype(jnp.float32)
        in_scale = 1.0

    N, C, H, W = a.shape
    HW = H * W
    itemsize = jnp.dtype(a.dtype).itemsize
    out_itemsize = jnp.dtype(out_dtype).itemsize

    # ---- lane-dense spatial layout ---------------------------------------
    padded = False
    if HW % 128 == 0:
        R, L = HW // 128, 128                     # free reshape, fully lane dense
        x = a.reshape(N, C, R, L)
    elif W / _round_up(W, 128) >= 0.5:
        R, L = H, W                               # full-width last dim, >=50% util
        x = a
    else:
        padded = True                             # narrow W: pad flat image
        R = _round_up(HW, 128) // 128
        L = 128
        x = a.reshape(N, C, HW)
        x = jnp.pad(x, ((0, 0), (0, 0), (0, R * 128 - HW)))
        x = x.reshape(N, C, R, L)
    lanes_pad = _round_up(L, 128)

    # cache channel-summed g from pass 1 when re-reading all C channels in
    # pass 2 would cost more HBM traffic than one extra f32 write per pixel
    use_g = C * itemsize > 8

    stats_budget = max_block_bytes if max_block_bytes else 12 * _MIB
    apply_budget = max_block_bytes if max_block_bytes else 8 * _MIB

    # ---- pass 1 tiling (input + optional g write; accumulator is resident)
    row1 = C * lanes_pad * itemsize + (lanes_pad * 4 if use_g else 0)
    TR1, NR1 = _tile_rows(stats_budget, row1, _sublane(a.dtype), R)

    # ---- pass 2 tiling (input + output)
    in2_item = 4 if use_g else itemsize
    in2_chan = 1 if use_g else C
    row2 = in2_chan * lanes_pad * in2_item + lanes_pad * out_itemsize
    sub2 = max(_sublane(jnp.float32 if use_g else a.dtype), _sublane(out_dtype))
    TR2, NR2 = _tile_rows(apply_budget, row2, sub2, R)

    # ---- masking needed by the stats reduction
    if padded:
        mask_mode, limit = "flat", HW
    elif NR1 * TR1 > R:
        mask_mode, limit = "rows", R
    else:
        mask_mode, limit = "none", 0

    def _vmem_limit(block_bytes):
        # 2x double buffering of all blocks + slack; <=48 MiB keeps v7x safe.
        return int(min(48 * _MIB, max(32 * _MIB, 2 * block_bytes + 4 * _MIB)))

    has_channels = C > 1
    chan_blk = C if has_channels else None        # squeeze channel dim if C==1

    # ===================== pass 1: per-lane min / max / sum ================
    stats_spec = pl.BlockSpec((None, 8, lanes_pad), lambda i, h: (i, 0, 0))
    out_shapes = [jax.ShapeDtypeStruct((N, 8, lanes_pad), jnp.float32)]
    out_specs = [stats_spec]
    if use_g:
        out_shapes.append(jax.ShapeDtypeStruct((N, R, L), jnp.float32))
        out_specs.append(pl.BlockSpec((None, TR1, L), lambda i, h: (i, h, 0)))

    block1_bytes = (C * TR1 * lanes_pad * itemsize + 8 * lanes_pad * 4
                    + (TR1 * lanes_pad * 4 if use_g else 0))

    pass1 = pl.pallas_call(
        functools.partial(_stats_kernel, has_channels=has_channels,
                          write_g=use_g, mask_mode=mask_mode, limit=limit,
                          tile_rows=TR1, lanes=L),
        out_shape=tuple(out_shapes) if use_g else out_shapes[0],
        grid=(N, NR1),
        in_specs=[pl.BlockSpec((None, chan_blk, TR1, L),
                               lambda i, h: (i, 0, h, 0))],
        out_specs=tuple(out_specs) if use_g else out_specs[0],
        compiler_params=pltpu.CompilerParams(
            dimension_semantics=("parallel", "arbitrary"),
            vmem_limit_bytes=_vmem_limit(block1_bytes)),
        cost_estimate=pl.CostEstimate(
            flops=int(N * R * L * (C + 4)),
            transcendentals=0,
            bytes_accessed=int(N * C * R * L * itemsize + N * 8 * lanes_pad * 4
                               + (N * R * L * 4 if use_g else 0))),
    )(x)

    if use_g:
        stats, g_img = pass1
    else:
        stats, g_img = pass1, None

    # ---- glue: per-sample affine coefficients (N scalars, plain XLA) ------
    s = in_scale / C                              # channel-sum -> channel-mean
    mn = jnp.min(stats[:, 0, :], axis=-1) * s
    mx = jnp.max(stats[:, 1, :], axis=-1) * s
    mean = jnp.sum(stats[:, 2, :], axis=-1) * (s / HW)
    rng = jnp.maximum(jnp.float32(0.5), mx - mn)  # max(0.5, g.max()-g.min())
    inv = 1.0 / rng
    if autoinvert:
        flip = (mean - mn) * inv > 0.5
        a_coef = jnp.where(flip, -inv, inv) * s
        b_coef = jnp.where(flip, 1.0 + mn * inv, -mn * inv)
    else:
        a_coef = inv * s
        b_coef = -mn * inv
    a_coef = a_coef.astype(jnp.float32)
    b_coef = b_coef.astype(jnp.float32)
    seed_arr = jnp.asarray(seed, dtype=jnp.int32).reshape(1)

    # ===================== pass 2: fused affine + noise + clip =============
    if use_g:
        data = g_img
        data_spec = pl.BlockSpec((None, TR2, L), lambda i, h: (i, h, 0))
        apply_has_channels = False
    else:
        data = x
        data_spec = pl.BlockSpec((None, chan_blk, TR2, L),
                                 lambda i, h: (i, 0, h, 0))
        apply_has_channels = has_channels

    block2_bytes = (in2_chan * TR2 * lanes_pad * in2_item
                    + TR2 * lanes_pad * out_itemsize)

    out = pl.pallas_call(
        functools.partial(_apply_kernel, has_channels=apply_has_channels,
                          noise=float(noise)),
        out_shape=jax.ShapeDtypeStruct((N, R, L), out_dtype),
        grid=(N, NR2),
        in_specs=[
            pl.BlockSpec(memory_space=pltpu.MemorySpace.SMEM),   # a_coef (N,)
            pl.BlockSpec(memory_space=pltpu.MemorySpace.SMEM),   # b_coef (N,)
            pl.BlockSpec(memory_space=pltpu.MemorySpace.SMEM),   # seed  (1,)
            data_spec,
        ],
        out_specs=pl.BlockSpec((None, TR2, L), lambda i, h: (i, h, 0)),
        compiler_params=pltpu.CompilerParams(
            dimension_semantics=("parallel", "parallel"),
            vmem_limit_bytes=_vmem_limit(block2_bytes)),
        cost_estimate=pl.CostEstimate(
            flops=int(N * R * L * (in2_chan + 6)),
            transcendentals=0,
            bytes_accessed=int(N * in2_chan * R * L * in2_item
                               + N * R * L * out_itemsize)),
    )(a_coef, b_coef, seed_arr, data)

    if padded:
        out = out.reshape(N, R * L)[:, :HW]
    return out.reshape(N, 1, H, W)


# --------------------------------------------------------------------------
# Pure-JAX reference mirroring the PyTorch loop (noise==0 comparisons only).
# --------------------------------------------------------------------------
def gray_document_ref(a, noise: float = 0.0, autoinvert: bool = True):
    a = jnp.asarray(a)
    if a.dtype == jnp.uint8:
        a = a.astype(jnp.float32) / 255.0
    a = a.astype(jnp.float32)
    if a.ndim == 3:
        a = a[:, None, :, :]
    g = jnp.mean(a, axis=1, keepdims=True)
    mn = jnp.min(g, axis=(1, 2, 3), keepdims=True)
    g = g - mn
    mx = jnp.maximum(0.5, jnp.max(g, axis=(1, 2, 3), keepdims=True))
    g = g / mx
    if autoinvert:
        m = jnp.mean(g, axis=(1, 2, 3), keepdims=True)
        g = jnp.where(m > 0.5, 1.0 - g, g)
    return jnp.clip(g, 0.0, 1.0)


if __name__ == "__main__":
    # Unused module parameter (only pins a device in torch): nn.Parameter(zeros(1))
    _val_param = jnp.zeros((1,), jnp.float32)

    key = jax.random.PRNGKey(0)
    k1, k2, k3, k4, k5 = jax.random.split(key, 5)

    # --- Test A: float32, 4 channels, HW % 128 == 0 (flat path + g caching) ---
    xa = jax.random.uniform(k1, (2, 4, 16, 16), dtype=jnp.float32)
    out_a = jax.block_until_ready(gray_document(xa))
    ref_a = gray_document_ref(xa)
    assert out_a.shape == (2, 1, 16, 16)
    assert jnp.allclose(out_a, ref_a, atol=2e-5, rtol=1e-5)

    # --- Test B: forced multi-tile grid; one bright sample (autoinvert) ---
    xb0 = jax.random.uniform(k2, (1, 4, 32, 64), dtype=jnp.float32) * 0.4
    xb1 = (jax.random.uniform(k3, (1, 4, 32, 64), dtype=jnp.float32) > 0.1
           ).astype(jnp.float32)
    xb = jnp.concatenate([xb0, xb1], axis=0)
    out_b = jax.block_until_ready(gray_document(xb, max_block_bytes=8192))
    ref_b = gray_document_ref(xb)
    assert jnp.allclose(out_b, ref_b, atol=2e-5, rtol=1e-5)

    # --- Test C: uint8, C==1, narrow W -> padded flat path + flat masking ---
    xc0 = jax.random.randint(k2, (1, 1, 40, 24), 0, 120, dtype=jnp.int32)
    xc1 = jnp.where(jax.random.uniform(k3, (1, 1, 40, 24)) < 0.05, 0, 255)
    xc = jnp.concatenate([xc0, xc1], axis=0).astype(jnp.uint8)
    out_c = jax.block_until_ready(gray_document(xc, max_block_bytes=4096))
    ref_c = gray_document_ref(xc)
    assert out_c.shape == (2, 1, 40, 24)
    assert jnp.allclose(out_c, ref_c, atol=1e-4, rtol=1e-5)

    # --- Test D: 3-D input path (N, H, W), C squeezed ---
    xd = jax.random.uniform(k4, (2, 16, 16), dtype=jnp.float32)
    out_d = jax.block_until_ready(gray_document(xd))
    ref_d = gray_document_ref(xd)
    assert out_d.shape == (2, 1, 16, 16)
    assert jnp.allclose(out_d, ref_d, atol=2e-5, rtol=1e-5)

    # --- Test E: additive noise path (clipped to [0, 1]) ---
    out_e = jax.block_until_ready(gray_document(xa, noise=0.1, seed=123))
    assert out_e.shape == (2, 1, 16, 16)
    assert bool(jnp.all(jnp.isfinite(out_e)))
    assert bool(jnp.all((out_e >= 0.0) & (out_e <= 1.0)))
    assert float(jnp.std(out_e - out_a)) > 1e-3

    # --- Test F: (H, W) layout path (W not a multiple of 128, >=50% util),
    #             ragged row tiles + rows masking, C=3 with g caching ---
    xf = jax.random.uniform(k5, (2, 3, 20, 100), dtype=jnp.float32) ** 2
    out_f = jax.block_until_ready(gray_document(xf, max_block_bytes=8192))
    ref_f = gray_document_ref(xf)
    assert out_f.shape == (2, 1, 20, 100)
    assert jnp.allclose(out_f, ref_f, atol=2e-5, rtol=1e-5)

    print("KERNEL_OK")
</pallas_src>

<mosaic_0001>
module attributes {stable_mosaic.version = 11 : i64} {
  func.func @_stats_kernel(%arg0: i32, %arg1: i32, %arg2: memref<1x4x2x128xf32, #tpu.memory_space<vmem>>, %arg3: memref<1x8x128xf32, #tpu.memory_space<vmem>>, %arg4: memref<1x2x128xf32, #tpu.memory_space<vmem>>) attributes {dimension_semantics = [#tpu.dimension_semantics<parallel>, #tpu.dimension_semantics<arbitrary>], iteration_bounds = array<i64: 2, 1>, scalar_prefetch = 0 : i64, scratch_operands = 0 : i64, tpu.core_type = #tpu.core_type<tc>, window_params = [{transform_indices = @transform_0, window_bounds = array<i64: 1, 4, 2, 128>}, {transform_indices = @transform_1, window_bounds = array<i64: 1, 8, 128>}, {transform_indices = @transform_2, window_bounds = array<i64: 1, 2, 128>}]} {
    %c0_i32 = arith.constant 0 : i32
    %0 = arith.cmpi eq, %arg1, %c0_i32 : i32
    %1 = arith.extui %0 : i1 to i32
    %c0_i32_0 = arith.constant 0 : i32
    %2 = arith.cmpi ne, %1, %c0_i32_0 : i32
    scf.if %2 {
      %cst_26 = arith.constant 0.000000e+00 : f32
      %33 = vector.broadcast %cst_26 : f32 to vector<8x128xf32>
      %c0_27 = arith.constant 0 : index
      %c0_28 = arith.constant 0 : index
      %c0_29 = arith.constant 0 : index
      %34 = vector.load %arg3[%c0_27, %c0_28, %c0_29] : memref<1x8x128xf32, #tpu.memory_space<vmem>>, vector<1x8x128xf32>
      %35 = vector.shape_cast %34 : vector<1x8x128xf32> to vector<8x128xf32>
      %36 = vector.shape_cast %33 : vector<8x128xf32> to vector<1x8x128xf32>
      tpu.vector_store %arg3[%c0_27, %c0_28, %c0_29], %36 {strides = array<i32>} : memref<1x8x128xf32, #tpu.memory_space<vmem>>, vector<1x8x128xf32>,
      %cst_30 = arith.constant 0x7F800000 : f32
      %37 = vector.broadcast %cst_30 : f32 to vector<1x128xf32>
      %c0_31 = arith.constant 0 : index
      %c0_32 = arith.constant 0 : index
      %c0_33 = arith.constant 0 : index
      %38 = vector.load %arg3[%c0_31, %c0_32, %c0_33] : memref<1x8x128xf32, #tpu.memory_space<vmem>>, vector<1x1x128xf32>
      %39 = vector.shape_cast %38 : vector<1x1x128xf32> to vector<1x128xf32>
      %40 = vector.shape_cast %37 : vector<1x128xf32> to vector<1x1x128xf32>
      tpu.vector_store %arg3[%c0_31, %c0_32, %c0_33], %40 {strides = array<i32>} : memref<1x8x128xf32, #tpu.memory_space<vmem>>, vector<1x1x128xf32>,
      %cst_34 = arith.constant 0xFF800000 : f32
      %41 = vector.broadcast %cst_34 : f32 to vector<1x128xf32>
      %c0_35 = arith.constant 0 : index
      %c1_36 = arith.constant 1 : index
      %c0_37 = arith.constant 0 : index
      %42 = vector.load %arg3[%c0_35, %c1_36, %c0_37] : memref<1x8x128xf32, #tpu.memory_space<vmem>>, vector<1x1x128xf32>
      %43 = vector.shape_cast %42 : vector<1x1x128xf32> to vector<1x128xf32>
      %44 = vector.shape_cast %41 : vector<1x128xf32> to vector<1x1x128xf32>
      tpu.vector_store %arg3[%c0_35, %c1_36, %c0_37], %44 {strides = array<i32>} : memref<1x8x128xf32, #tpu.memory_space<vmem>>, vector<1x1x128xf32>,
    } else {
    }
    %c0 = arith.constant 0 : index
    %c0_1 = arith.constant 0 : index
    %c0_2 = arith.constant 0 : index
    %c0_3 = arith.constant 0 : index
    %3 = vector.load %arg2[%c0, %c0_1, %c0_2, %c0_3] : memref<1x4x2x128xf32, #tpu.memory_space<vmem>>, vector<1x4x2x128xf32>
    %4 = vector.shape_cast %3 : vector<1x4x2x128xf32> to vector<4x2x128xf32>
    %cst = arith.constant dense<0.000000e+00> : vector<2x128xf32>
    %5 = vector.multi_reduction <add>, %4, %cst [0] : vector<4x2x128xf32> to vector<2x128xf32>
    %c0_4 = arith.constant 0 : index
    %c0_5 = arith.constant 0 : index
    %c0_6 = arith.constant 0 : index
    %6 = vector.load %arg4[%c0_4, %c0_5, %c0_6] : memref<1x2x128xf32, #tpu.memory_space<vmem>>, vector<1x2x128xf32>
    %7 = vector.shape_cast %6 : vector<1x2x128xf32> to vector<2x128xf32>
    %8 = vector.shape_cast %5 : vector<2x128xf32> to vector<1x2x128xf32>
    tpu.vector_store %arg4[%c0_4, %c0_5, %c0_6], %8 {strides = array<i32>} : memref<1x2x128xf32, #tpu.memory_space<vmem>>, vector<1x2x128xf32>,
    %cst_7 = arith.constant dense<0x7F800000> : vector<128xf32>
    %9 = vector.multi_reduction <minimumf>, %5, %cst_7 [0] : vector<2x128xf32> to vector<128xf32>
    %10 = vector.shape_cast %9 : vector<128xf32> to vector<1x128xf32>
    %cst_8 = arith.constant dense<0xFF800000> : vector<128xf32>
    %11 = vector.multi_reduction <maximumf>, %5, %cst_8 [0] : vector<2x128xf32> to vector<128xf32>
    %12 = vector.shape_cast %11 : vector<128xf32> to vector<1x128xf32>
    %cst_9 = arith.constant dense<0.000000e+00> : vector<128xf32>
    %13 = vector.multi_reduction <add>, %5, %cst_9 [0] : vector<2x128xf32> to vector<128xf32>
    %14 = vector.shape_cast %13 : vector<128xf32> to vector<1x128xf32>
    %c0_10 = arith.constant 0 : index
    %c0_11 = arith.constant 0 : index
    %c0_12 = arith.constant 0 : index
    %15 = vector.load %arg3[%c0_10, %c0_11, %c0_12] : memref<1x8x128xf32, #tpu.memory_space<vmem>>, vector<1x1x128xf32>
    %16 = vector.shape_cast %15 : vector<1x1x128xf32> to vector<1x128xf32>
    %17 = arith.minimumf %16, %10 : vector<1x128xf32>
    %c0_13 = arith.constant 0 : index
    %c0_14 = arith.constant 0 : index
    %c0_15 = arith.constant 0 : index
    %18 = vector.load %arg3[%c0_13, %c0_14, %c0_15] : memref<1x8x128xf32, #tpu.memory_space<vmem>>, vector<1x1x128xf32>
    %19 = vector.shape_cast %18 : vector<1x1x128xf32> to vector<1x128xf32>
    %20 = vector.shape_cast %17 : vector<1x128xf32> to vector<1x1x128xf32>
    tpu.vector_store %arg3[%c0_13, %c0_14, %c0_15], %20 {strides = array<i32>} : memref<1x8x128xf32, #tpu.memory_space<vmem>>, vector<1x1x128xf32>,
    %c0_16 = arith.constant 0 : index
    %c1 = arith.constant 1 : index
    %c0_17 = arith.constant 0 : index
    %21 = vector.load %arg3[%c0_16, %c1, %c0_17] : memref<1x8x128xf32, #tpu.memory_space<vmem>>, vector<1x1x128xf32>
    %22 = vector.shape_cast %21 : vector<1x1x128xf32> to vector<1x128xf32>
    %23 = arith.maximumf %22, %12 : vector<1x128xf32>
    %c0_18 = arith.constant 0 : index
    %c1_19 = arith.constant 1 : index
    %c0_20 = arith.constant 0 : index
    %24 = vector.load %arg3[%c0_18, %c1_19, %c0_20] : memref<1x8x128xf32, #tpu.memory_space<vmem>>, vector<1x1x128xf32>
    %25 = vector.shape_cast %24 : vector<1x1x128xf32> to vector<1x128xf32>
    %26 = vector.shape_cast %23 : vector<1x128xf32> to vector<1x1x128xf32>
    tpu.vector_store %arg3[%c0_18, %c1_19, %c0_20], %26 {strides = array<i32>} : memref<1x8x128xf32, #tpu.memory_space<vmem>>, vector<1x1x128xf32>,
    %c0_21 = arith.constant 0 : index
    %c2 = arith.constant 2 : index
    %c0_22 = arith.constant 0 : index
    %27 = vector.load %arg3[%c0_21, %c2, %c0_22] : memref<1x8x128xf32, #tpu.memory_space<vmem>>, vector<1x1x128xf32>
    %28 = vector.shape_cast %27 : vector<1x1x128xf32> to vector<1x128xf32>
    %29 = arith.addf %28, %14 : vector<1x128xf32>
    %c0_23 = arith.constant 0 : index
    %c2_24 = arith.constant 2 : index
    %c0_25 = arith.constant 0 : index
    %30 = vector.load %arg3[%c0_23, %c2_24, %c0_25] : memref<1x8x128xf32, #tpu.memory_space<vmem>>, vector<1x1x128xf32>
    %31 = vector.shape_cast %30 : vector<1x1x128xf32> to vector<1x128xf32>
    %32 = vector.shape_cast %29 : vector<1x128xf32> to vector<1x1x128xf32>
    tpu.vector_store %arg3[%c0_23, %c2_24, %c0_25], %32 {strides = array<i32>} : memref<1x8x128xf32, #tpu.memory_space<vmem>>, vector<1x1x128xf32>,
    return
  }
  func.func @transform_0(%arg0: i32, %arg1: i32) -> (i32, i32, i32, i32) {
    %c0_i32 = arith.constant 0 : i32
    %c0_i32_0 = arith.constant 0 : i32
    %c0_i32_1 = arith.constant 0 : i32
    return %arg0, %c0_i32, %arg1, %c0_i32_0 : i32, i32, i32, i32
  }
  func.func @transform_1(%arg0: i32, %arg1: i32) -> (i32, i32, i32) {
    %c0_i32 = arith.constant 0 : i32
    %c0_i32_0 = arith.constant 0 : i32
    %c0_i32_1 = arith.constant 0 : i32
    return %arg0, %c0_i32, %c0_i32_0 : i32, i32, i32
  }
  func.func @transform_2(%arg0: i32, %arg1: i32) -> (i32, i32, i32) {
    %c0_i32 = arith.constant 0 : i32
    %c0_i32_0 = arith.constant 0 : i32
    return %arg0, %arg1, %c0_i32 : i32, i32, i32
  }
}

</mosaic_0001>

<bundles_post_ra>
// kernel: tpu_custom_call.1
= control target key start
LH: loop header
LB: loop body
LE: loop exit
PB: predicated region body
PF: predicated region fallthrough
CT: control target
= control target key end

     0   :  { %8 = vsyncpa [#allocation3], 0  ;;  %s803_s0 = inlined_call_operand.hbm [shape: f32[2,4,2,128], index: 0, kind: input, shape index: {}]   ;;  %s804_s1 = inlined_call_operand.hbm [shape: f32[2,8,128], index: 1, kind: output, shape index: {0}]   ;;  %s805_s2 = inlined_call_operand.hbm [shape: f32[2,2,128], index: 2, kind: output, shape index: {1}]  }
   0x1   :  { %10 = vsyncpa [#allocation3 + $0x1], 0 }
   0x2   :  { %11 = vsyncpa [#allocation4], 0 }
   0x3   :  { %13 = vsyncpa [#allocation4 + $0x1], 0 }
   0x4   :  { %14 = vsyncpa [#allocation7], 0 }
   0x5   :  { %16 = vsyncpa [#allocation7 + $0x1], 0  ;;  %s648_s9 = smov 0   ;;  %s650_s10 = smov 0  }
   0x6   :  { %s652_s11 = smov 0   ;;  %s654_s12 = smov 0  }
   0x7   :  { %s656_s13 = smov 0   ;;  %s658_s14 = smov 0  }
   0x8 LB: > { %s392_s15 = sadd.s32 4294967295, %s626_s14   ;;  %s393_s16 = sadd.s32 4294967294, %s626_s14   ;;  %s626_s14 = sphi %s658_s14, %s22_s14   ;;  %s622_s13 = sphi %s656_s13, %s814_s13   ;;  %s618_s12 = sphi %s654_s12, %s813_s12   ;;  %s614_s11 = sphi %s652_s11, %s812_s11   ;;  %s610_s10 = sphi %s650_s10, %s811_s10   ;;  %s606_s9 = sphi %s648_s9, %s810_s9  }
   0x9   : > { %s34_s17 = sadd.s32 1, %s622_s13  ;;  %s43_s18 = sadd.s32 1, %s614_s11 }
   0xa   : > { %p36_p0 = scmp.ge.s32.totalorder %s34_s17, 2  ;;  %p50_p1 = scmp.ne.s32.totalorder %s614_s11, %s610_s10 }
   0xb   : > { %p51_p2 = scmp.eq.s32.totalorder %s626_s14, 0  ;;  %p56_p3 = scmp.ne.s32.totalorder %s610_s10, %s606_s9 }
   0xc   : > { %s816_s17 = smov (%p36_p0, %s34_s17), 0  ;;  %p57_p5 = scmp.eq.s32.totalorder %s392_s15, 0 }
   0xd   : > { %p689_p4 = por %p51_p2, %p50_p1  ;;  %s38_s20 = ssub.s32 %s622_s13, %s816_s17 }
   0xe   : > { %p80_p6 = scmp.eq.s32.totalorder %s392_s15, 1  ;;  %p41_p7 = scmp.eq.s32.totalorder %s38_s20, 0 }
   0xf   : > { %p695_p8 = por %p57_p5, %p56_p3  ;;  %p86_p10 = scmp.eq.s32.totalorder %s393_s16, 1 }
  0x10   : > { %p699_p9 = por %p80_p6, %p50_p1  ;;  %p395_p12 = scmp.ge.s32.totalorder %s626_s14, 2 }
  0x11   : > { %s704_s23 = scalar_select %p41_p7, %s614_s11, %s43_s18  }
  0x12   : > { %p706_p11 = por %p86_p10, %p56_p3  ;;  %p427_p13 = scmp.lt.s32.totalorder %s626_s14, 2 }
  0x13   : > { %s134_s25 = sand.u32 1, %s614_s11   ;;  %s409_s27 = sshll.u32 %s622_s13, 3 }
  0x14   : > { %s396_s26 = sshll.u32 %s134_s25, 3  ;;  %s144_s30 = scalar_lea.hbm %s803_s0, %s409_s27 }
  0x15   : > { %s138_s3 = scalar_lea.vmem [#allocation2], %s396_s26  ;;  %s145_s5 = sshll.u32 %s144_s30, 4  ;;  %s146_s5 = int_to_ptr.hbm [resolvable:$true] %s145_s5 }
  0x16   : > { %s147_s4 = sshll.u32 %s138_s3, 4  ;;  %p417_p0 = pnand %p427_p13, %p689_p4  ;;  %s148_s4 = int_to_ptr.vmem [resolvable:$true] %s147_s4 }
  0x17   : > { %p399_p1 = scmp.ge.s32.totalorder %s626_s14, 1  ;;  %s135_s6 = scalar_lea.sflag [#allocation3], %s134_s25 }
  0x18   : > { %s628_s7 = smov 32   ;;  %s629_s8 = smov 2  }
  0x19   : > { %419 = dma.hbm_to_vmem [thread:$0]  (!%p417_p0), %s146_s5, 128, %s148_s4, %s135_s6, %s628_s7, %s628_s7, %s629_s8  }
  0x1a   : > { %p155_p2 = scmp.lt.s32.totalorder %s626_s14, 3 }
  0x1c   : > { %p156_p3 = pnand %p399_p1, %p155_p2 }
  0x1d   : > { %s722_s15 = sand.u32 (!%p156_p3), 1, %s610_s10  }
  0x1e   : > { %159 = sbr.rel (%p156_p3) target bundleno = 69 (0x45), region = 24  ;;  %s400_s16 = sshll.u32 (!%p156_p3), %s722_s15, 3 }
  0x1f   : > { %s162_s18 = scalar_lea.sflag (!%p156_p3), [#allocation3], %s722_s15  ;;  %s165_s20 = scalar_lea.vmem (!%p156_p3), [#allocation2], %s400_s16 }
  0x23   : > { %593 = dma.done.wait (%p695_p8), %s162_s18, 128  }
  0x24   : > { %595 = vsyncadd (%p695_p8), %s162_s18, 4294967168  ;;  %s730_s19 = scalar_lea.vmem [#allocation5], %s400_s16  ;;  %v630_v0 = vmov 0.0   ;;  %v631_v1 = vmov inf   ;;  %v632_v2 = vmov -inf   ;;  %s402_s25 = sshll.u32 %s722_s15, 1 }
  0x25   : > { %196 = vst [vmem:[%s730_s19] sm:$0xff] %v630_v0  ;;  %vm203_vm0 = vcmask 1041408   ;;  %s406_s26 = sshll.u32 %s618_s12, 1  ;;  %v199_v3 = vld [vmem:[%s165_s20] sm:$0x3]  ;;  %v200_v4 = vld [vmem:[%s165_s20 + $0x2] sm:$0x3] }
  0x26   : > { %197 = vst [vmem:[%s730_s19] sm:$0x1] %v631_v1  ;;  %v201_v5 = vld [vmem:[%s165_s20 + $0x4] sm:$0x3]  ;;  %s273_s28 = scalar_lea.hbm %s805_s2, %s406_s26  ;;  %v202_v6 = vld [vmem:[%s165_s20 + $0x6] sm:$0x3]  ;;  %v204_v7 = vsel %vm203_vm0, %v199_v3, 0.0 }
  0x27   : > { %198 = vst [vmem:[%s730_s19 + $0x1] sm:$0x1] %v632_v2  ;;  %v205_v8 = vsel %vm203_vm0, %v200_v4, 0.0  ;;  %v207_v9 = vsel %vm203_vm0, %v201_v5, 0.0  ;;  %s191_s29 = scalar_lea.vmem [#allocation6], %s402_s25  ;;  %v209_v11 = vsel %vm203_vm0, %v202_v6, 0.0 }
  0x28   : > { %v206_v10 = vadd.f32 %v205_v8, %v204_v7  ;;  %s275_s30 = sshll.u32 %s191_s29, 4  ;;  %s277_s3 = sshll.u32 %s273_s28, 4  ;;  %s276_s30 = int_to_ptr.vmem [resolvable:$true] %s275_s30  ;;  %s278_s3 = int_to_ptr.hbm [resolvable:$true] %s277_s3 }
  0x29   : > { %s248_s4 = scalar_lea.sflag [#allocation7], %s722_s15  ;;  %s526_s5 = sshra.s32 %s278_s3, 4  ;;  %s527_s5 = int_to_ptr.hbm [resolvable:$true] %s526_s5 }
  0x2a   : > { %v208_v12 = vadd.f32 %v207_v9, %v206_v10  ;;  %s528_s6 = scalar_lea.hbm %s527_s5, 2  ;;  %s532_s16 = scalar_lea.hbm %s805_s2, 4 }
  0x2b   : > { %p529_p4 = scmp.ne.s32.totalorder %s527_s5, %s528_s6  ;;  %p533_p7 = scmp.lt.s32.totalorder %s527_s5, %s805_s2 }
  0x2c   : > { %v210_v13 = vadd.f32 %v209_v11, %v208_v12  ;;  %p534_p8 = scmp.lt.s32.totalorder %s532_s16, %s528_s6 }
  0x2d   : > { %p530_p5 = pnand %p529_p4, %p699_p9 }
  0x2e   : > { %211 = vst [vmem:[%s191_s29] sm:$0x3] %v210_v13  ;;  %v212_v14 = vsel %vm203_vm0, %v210_v13, inf  ;;  %v219_v15 = vsel %vm203_vm0, %v210_v13, -inf  ;;  %v226_v16 = vsel %vm203_vm0, %v210_v13, 0.0  ;;  %p535_p10 = por %p534_p8, %p533_p7 }
  0x2f   : > { %v213_v17 = vrot.slane %v212_v14, 4  ;;  %v220_v18 = vrot.slane %v219_v15, 4  ;;  %v227_v19 = vrot.slane %v226_v16, 4  ;;  %p531_p6 = pneg %p530_p5 }
  0x31   : > { %p536_p13 = pnand %p535_p10, %p531_p6 }
  0x33   : > { %539 = shalt.err (!%p536_p13)
}
  0x34   : > { %413 = dma.vmem_to_hbm [thread:$0]  (%p699_p9), %s276_s30, 32, %s278_s3, %s248_s4   ;;  %v214_v20 = vmin.f32 %v212_v14, %v213_v17  ;;  %v221_v21 = vmax.f32 %v219_v15, %v220_v18  ;;  %v228_v22 = vadd.f32 %v227_v19, %v226_v16  ;;  %v233_v32 = vld [vmem:[%s730_s19] sm:$0x1]  ;;  %v236_v33 = vld [vmem:[%s730_s19 + $0x1] sm:$0x1] }
  0x35   : > { %s405_s25 = sshll.u32 %s618_s12, 3  ;;  %v239_v34 = vld [vmem:[%s730_s19 + $0x2] sm:$0x1]  ;;  %s260_s12 = sshll.u32 %s730_s19, 4  ;;  %s261_s12 = int_to_ptr.vmem [resolvable:$true] %s260_s12 }
  0x36   : > { %v215_v23 = vrot.slane %v214_v20, 2  ;;  %v222_v24 = vrot.slane %v221_v21, 2  ;;  %v229_v25 = vrot.slane %v228_v22, 2  ;;  %s258_s27 = scalar_lea.hbm %s804_s1, %s405_s25  ;;  %s243_s29 = scalar_lea.sflag [#allocation4], %s722_s15 }
  0x37   : > { %s262_s28 = sshll.u32 %s258_s27, 4  ;;  %s560_s6 = scalar_lea.hbm %s804_s1, 16  ;;  %s263_s28 = int_to_ptr.hbm [resolvable:$true] %s262_s28 }
  0x38   : > { %v216_v26 = vmin.f32 %v214_v20, %v215_v23  ;;  %v223_v27 = vmax.f32 %v221_v21, %v222_v24  ;;  %v230_v28 = vadd.f32 %v229_v25, %v228_v22  ;;  %s554_s30 = sshra.s32 %s263_s28, 4  ;;  %s555_s30 = int_to_ptr.hbm [resolvable:$true] %s554_s30 }
  0x39   : > { %s556_s3 = scalar_lea.hbm %s555_s30, 8  ;;  %p561_p3 = scmp.lt.s32.totalorder %s555_s30, %s804_s1 }
  0x3a   : > { %v217_v29 = vrot.slane %v216_v26, 1  ;;  %v224_v30 = vrot.slane %v223_v27, 1  ;;  %v231_v31 = vrot.slane %v230_v28, 1  ;;  %p557_p0 = scmp.ne.s32.totalorder %s555_s30, %s556_s3  ;;  %p562_p4 = scmp.lt.s32.totalorder %s560_s6, %s556_s3 }
  0x3c   : > { %v218_v35 = vmin.f32 %v216_v26, %v217_v29  ;;  %v225_v36 = vmax.f32 %v223_v27, %v224_v30  ;;  %v232_v37 = vadd.f32 %v231_v31, %v230_v28  ;;  %p558_p1 = pnand %p557_p0, %p699_p9  ;;  %p563_p5 = por %p562_p4, %p561_p3 }
  0x3e   : > { %v234_v38 = vmin.f32 %v233_v32, %v218_v35  ;;  %v237_v39 = vmax.f32 %v236_v33, %v225_v36  ;;  %v240_v40 = vadd.f32 %v239_v34, %v232_v37  ;;  %p559_p2 = pneg %p558_p1 }
  0x40   : > { %235 = vst [vmem:[%s730_s19] sm:$0x1] %v234_v38  ;;  %p564_p6 = pnand %p563_p5, %p559_p2 }
  0x41   : > { %238 = vst [vmem:[%s730_s19 + $0x1] sm:$0x1] %v237_v39 }
  0x42   : > { %241 = vst [vmem:[%s730_s19 + $0x2] sm:$0x1] %v240_v40 }
  0x43   : > { %567 = shalt.err (!%p564_p6)
}
  0x44   : > { %412 = dma.vmem_to_hbm [thread:$0]  (%p699_p9), %s261_s12, 128, %s263_s28, %s243_s29  }
  0x45 PF: > { %s289_s15 = sand.u32 1, %s606_s9   ;;  %p421_p7 = pnand %p395_p12, %p706_p11 }
  0x46   : > { %s290_s19 = scalar_lea.sflag [#allocation4], %s289_s15 }
  0x47   : > { %p422_p8 = pneg %p421_p7 }
  0x49   : > { %597 = dma.done.wait (%p422_p8), %s290_s19, 128  }
  0x4a   : > { %599 = vsyncadd (%p422_p8), %s290_s19, 4294967168  ;;  %s300_s16 = scalar_lea.sflag [#allocation7], %s289_s15 }
  0x4b   : > { %601 = dma.done.wait (%p422_p8), %s300_s16, 32  }
  0x4c   : > { %603 = vsyncadd (%p422_p8), %s300_s16, 4294967264  ;;  %s22_s14 = sadd.s32 1, %s626_s14   ;;  %s810_s9 = smov %s610_s10 }
  0x4d   : > { %p19_p10 = scmp.ge.s32.totalorder %s22_s14, 4   ;;  %s811_s10 = smov %s614_s11 }
  0x4e   : > { %s812_s11 = smov %s704_s23  ;;  %s813_s12 = smov %s622_s13 }
  0x4f   : > { %s814_s13 = smov %s816_s17  ;;  %21 = sbr.rel (!%p19_p10) target bundleno = 8 (0x8), region = 90 }
  0x54   :  { %306 = vsyncpa [#allocation3], 1 }
  0x55   :  { %308 = vsyncpa [#allocation3 + $0x1], 1 }
  0x56   :  { %309 = vsyncpa [#allocation4], 1 }
  0x57   :  { %311 = vsyncpa [#allocation4 + $0x1], 1 }
  0x58   :  { %312 = vsyncpa [#allocation7], 1 }
  0x59   :  { %314 = vsyncpa [#allocation7 + $0x1], 1 }

</bundles_post_ra>
